<compile_context>
chip_gen: v6e
topology: v6e:2x2x1
jax: 0.10.0
libtpu: 0.0.40
codegen_flags: <defaults>
</compile_context>

<pallas_src>
import jax
import jax.numpy as jnp
from jax.experimental import pallas as pl
from jax.experimental.pallas import tpu as pltpu


def _round_up(n, m):
    return ((n + m - 1) // m) * m


# --------------------------------------------------------------------------
# Kernel
# --------------------------------------------------------------------------
def _vae_kernel(x_ref, eps_ref,
                w1_ref, b1_ref, w2_ref, b2_ref,
                w3_ref, b3_ref,                      # fused mu||log_var proj
                w4_ref, b4_ref, w5_ref, b5_ref, w6_ref, b6_ref,
                recon_ref, mulv_ref):
    f32 = jnp.float32
    mxu_dt = w1_ref.dtype                            # bf16 MXU operands

    # f32 HBM read; downcast to bf16 only for the MXU (no wrapper cast pass).
    x = x_ref[...].astype(mxu_dt)                    # (TILE_B, 784)

    # ----- encoder -----
    h = jnp.dot(x, w1_ref[...], preferred_element_type=f32) + b1_ref[...]
    h = jnp.maximum(h, 0.0).astype(mxu_dt)           # relu(fc1)
    h = jnp.dot(h, w2_ref[...], preferred_element_type=f32) + b2_ref[...]
    h = jnp.maximum(h, 0.0).astype(mxu_dt)           # relu(fc2)

    # fused fc31/fc32:  (TILE_B, 2*z_dim) in f32
    mulv = jnp.dot(h, w3_ref[...], preferred_element_type=f32) + b3_ref[...]
    z_dim = eps_ref.shape[-1]
    mu = mulv[:, :z_dim]
    log_var = mulv[:, z_dim:]

    # ----- reparameterization: z = eps * exp(0.5*log_var) + mu  (f32) -----
    std = jnp.exp(0.5 * log_var)
    z = (eps_ref[...] * std + mu).astype(mxu_dt)

    # Pad K up to w4's (zero-padded) row count so bf16 (16,128) sublane
    # packing does not force a relayout before the decoder's first dot.
    k_pad = w4_ref.shape[0]
    if k_pad > z_dim:
        z = jnp.concatenate(
            [z, jnp.zeros((z.shape[0], k_pad - z_dim), dtype=z.dtype)], axis=-1)

    # ----- decoder -----
    d = jnp.dot(z, w4_ref[...], preferred_element_type=f32) + b4_ref[...]
    d = jnp.maximum(d, 0.0).astype(mxu_dt)           # relu(fc4)
    d = jnp.dot(d, w5_ref[...], preferred_element_type=f32) + b5_ref[...]
    d = jnp.maximum(d, 0.0).astype(mxu_dt)           # relu(fc5)
    logits = jnp.dot(d, w6_ref[...], preferred_element_type=f32) + b6_ref[...]

    # sigmoid(x) = 0.5*(tanh(x/2)+1): one EUP tanh, no divide.  f32 store.
    recon_ref[...] = (0.5 * (jnp.tanh(0.5 * logits) + 1.0)).astype(recon_ref.dtype)
    mulv_ref[...] = mulv                             # f32 store (mu || log_var)


# --------------------------------------------------------------------------
# One-time weight preparation (hoisted out of the per-call hot path)
# --------------------------------------------------------------------------
def prepare_params(params, mxu_dtype=jnp.bfloat16):
    """Cast/fuse/pad weights once; returns the tuple vae_forward consumes."""
    f32 = jnp.float32
    z_dim = params["w31"].shape[1]
    zk = max(_round_up(z_dim, 16), 16)               # bf16 sublane packing tile
    w4 = params["w4"].astype(f32)
    if zk > z_dim:
        w4 = jnp.pad(w4, ((0, zk - z_dim), (0, 0)))  # zero rows: no effect on dot
    return (
        params["w1"].astype(mxu_dtype), params["b1"].astype(f32),
        params["w2"].astype(mxu_dtype), params["b2"].astype(f32),
        jnp.concatenate([params["w31"], params["w32"]], axis=1).astype(mxu_dtype),
        jnp.concatenate([params["b31"], params["b32"]], axis=1).astype(f32),
        w4.astype(mxu_dtype), params["b4"].astype(f32),
        params["w5"].astype(mxu_dtype), params["b5"].astype(f32),
        params["w6"].astype(mxu_dtype), params["b6"].astype(f32),
    )


def _const_weight_spec(shape):
    """VMEM-resident weight spec; single-buffered when the API supports it."""
    try:
        return pl.BlockSpec(shape, lambda i: (0, 0),
                            pipeline_mode=pl.Buffered(1))
    except (TypeError, AttributeError):
        return pl.BlockSpec(shape, lambda i: (0, 0))


def _pick_tile_b(batch, max_tile=1024):
    """Multiple of 8; >=2 grid steps whenever the batch can be split."""
    b8 = _round_up(max(batch, 1), 8)
    if b8 <= 8:
        return 8
    return min(max_tile, _round_up((b8 + 1) // 2, 8))


# --------------------------------------------------------------------------
# Wrapper
# --------------------------------------------------------------------------
def vae_forward(x, eps, params_or_weights, tile_b=None):
    """x: [B,1,28,28] (anything flattening to [B,784]); eps: [B, z_dim].

    Returns (recon[f32, B x 784], mu[f32, B x z], log_var[f32, B x z]).
    Pass prepare_params(params) (cached) to avoid per-call weight prep.
    """
    f32 = jnp.float32
    weights = (prepare_params(params_or_weights)
               if isinstance(params_or_weights, dict)
               else tuple(params_or_weights))
    w1, b1, w2, b2, w3, b3, w4, b4, w5, b5, w6, b6 = weights

    x_dim = w1.shape[0]
    z_dim = w3.shape[1] // 2

    x2d = x.reshape(-1, x_dim).astype(f32)           # x.view(-1, 784); no bf16 copy
    B = x2d.shape[0]
    eps_f = eps.astype(f32)

    if tile_b is None:
        tile_b = _pick_tile_b(B)
    b_pad = _round_up(B, tile_b)
    grid = (b_pad // tile_b,)

    if b_pad != B:
        x2d = jnp.pad(x2d, ((0, b_pad - B), (0, 0)))
        eps_f = jnp.pad(eps_f, ((0, b_pad - B), (0, 0)))

    # --- BlockSpecs: batch-tiled activations, VMEM-resident weights ---
    in_specs = (
        [pl.BlockSpec((tile_b, x_dim), lambda i: (i, 0)),     # x (f32)
         pl.BlockSpec((tile_b, z_dim), lambda i: (i, 0))]     # eps (f32)
        + [_const_weight_spec(w.shape) for w in weights]
    )
    out_specs = (
        pl.BlockSpec((tile_b, x_dim), lambda i: (i, 0)),      # recon (f32)
        pl.BlockSpec((tile_b, 2 * z_dim), lambda i: (i, 0)),  # mu || log_var (f32)
    )

    # --- advisory cost estimate ---
    h1 = w1.shape[1]
    h2 = w2.shape[1]
    flops_per_row = 2 * (x_dim * h1 + h1 * h2 + h2 * 2 * z_dim
                         + w4.shape[0] * h2 + h2 * h1 + h1 * x_dim)
    bytes_per_row = (x_dim * 4) + (z_dim * 4) + (x_dim * 4) + (2 * z_dim * 4)
    weight_bytes = sum(int(w.size) * w.dtype.itemsize for w in weights)
    cost = pl.CostEstimate(
        flops=flops_per_row * b_pad,
        transcendentals=(z_dim + x_dim) * b_pad,
        bytes_accessed=bytes_per_row * b_pad + weight_bytes,
    )

    recon_pad, mulv_pad = pl.pallas_call(
        _vae_kernel,
        grid=grid,
        out_shape=(
            jax.ShapeDtypeStruct((b_pad, x_dim), f32),
            jax.ShapeDtypeStruct((b_pad, 2 * z_dim), f32),
        ),
        in_specs=in_specs,
        out_specs=out_specs,
        compiler_params=pltpu.CompilerParams(
            dimension_semantics=("parallel",),
            vmem_limit_bytes=64 * 1024 * 1024),
        cost_estimate=cost,
    )(x2d, eps_f, *weights)

    recon = recon_pad[:B]
    mu = mulv_pad[:B, :z_dim]
    log_var = mulv_pad[:B, z_dim:]
    return recon, mu, log_var


# --------------------------------------------------------------------------
# Reference + demo
# --------------------------------------------------------------------------
def _vae_reference(x, eps, params, x_dim=784):
    x2d = x.reshape(-1, x_dim)
    h = jax.nn.relu(x2d @ params["w1"] + params["b1"])
    h = jax.nn.relu(h @ params["w2"] + params["b2"])
    mu = h @ params["w31"] + params["b31"]
    log_var = h @ params["w32"] + params["b32"]
    z = eps * jnp.exp(0.5 * log_var) + mu
    d = jax.nn.relu(z @ params["w4"] + params["b4"])
    d = jax.nn.relu(d @ params["w5"] + params["b5"])
    recon = jax.nn.sigmoid(d @ params["w6"] + params["b6"])
    return recon, mu, log_var


def init_params(key, x_dim=784, h_dim1=64, h_dim2=32, z_dim=8):
    """Deterministic synthetic parameter init (Linear weights as (in, out))."""
    dims = {
        "1": (x_dim, h_dim1), "2": (h_dim1, h_dim2),
        "31": (h_dim2, z_dim), "32": (h_dim2, z_dim),
        "4": (z_dim, h_dim2), "5": (h_dim2, h_dim1), "6": (h_dim1, x_dim),
    }
    params = {}
    keys = jax.random.split(key, 2 * len(dims))
    for i, (name, (fin, fout)) in enumerate(dims.items()):
        scale = 1.0 / jnp.sqrt(jnp.float32(fin))
        params[f"w{name}"] = scale * jax.random.normal(
            keys[2 * i], (fin, fout), dtype=jnp.float32)
        params[f"b{name}"] = scale * jax.random.normal(
            keys[2 * i + 1], (1, fout), dtype=jnp.float32)
    return params


if __name__ == "__main__":
    key = jax.random.PRNGKey(0)
    k_param, k_x, k_eps = jax.random.split(key, 3)

    B, z_dim = 2, 8
    params = init_params(k_param, x_dim=784, h_dim1=64, h_dim2=32, z_dim=z_dim)
    weights = prepare_params(params)          # hoisted one-time weight prep

    # MNIST-like input: [B, 1, 28, 28] -> flattened to [B, 784] inside wrapper.
    x = jax.random.uniform(k_x, (B, 1, 28, 28), dtype=jnp.float32)
    # eps replaces torch.randn_like(std) — drawn once, deterministically.
    eps = jax.random.normal(k_eps, (B, z_dim), dtype=jnp.float32)

    recon, mu, log_var = vae_forward(x, eps, weights)
    jax.block_until_ready((recon, mu, log_var))

    assert recon.shape == (B, 784) and mu.shape == (B, z_dim) and log_var.shape == (B, z_dim)
    assert bool(jnp.all(jnp.isfinite(recon)))

    # Loose tolerance: weights/activations run through the MXU in bf16.
    r_ref, mu_ref, lv_ref = _vae_reference(x, eps, params)
    assert jnp.allclose(mu, mu_ref, atol=5e-2, rtol=5e-2)
    assert jnp.allclose(log_var, lv_ref, atol=5e-2, rtol=5e-2)
    assert jnp.allclose(recon, r_ref, atol=5e-2, rtol=5e-2)

    print("KERNEL_OK")
</pallas_src>

<mosaic_0001>
module attributes {stable_mosaic.version = 11 : i64} {
  func.func @_vae_kernel(%arg0: i32, %arg1: memref<8x784xf32, #tpu.memory_space<vmem>>, %arg2: memref<8x8xf32, #tpu.memory_space<vmem>>, %arg3: memref<784x64xbf16, #tpu.memory_space<vmem>>, %arg4: memref<1x64xf32, #tpu.memory_space<vmem>>, %arg5: memref<64x32xbf16, #tpu.memory_space<vmem>>, %arg6: memref<1x32xf32, #tpu.memory_space<vmem>>, %arg7: memref<32x16xbf16, #tpu.memory_space<vmem>>, %arg8: memref<1x16xf32, #tpu.memory_space<vmem>>, %arg9: memref<16x32xbf16, #tpu.memory_space<vmem>>, %arg10: memref<1x32xf32, #tpu.memory_space<vmem>>, %arg11: memref<32x64xbf16, #tpu.memory_space<vmem>>, %arg12: memref<1x64xf32, #tpu.memory_space<vmem>>, %arg13: memref<64x784xbf16, #tpu.memory_space<vmem>>, %arg14: memref<1x784xf32, #tpu.memory_space<vmem>>, %arg15: memref<8x784xf32, #tpu.memory_space<vmem>>, %arg16: memref<8x16xf32, #tpu.memory_space<vmem>>) attributes {dimension_semantics = [#tpu.dimension_semantics<parallel>], iteration_bounds = array<i64: 1>, scalar_prefetch = 0 : i64, scratch_operands = 0 : i64, tpu.core_type = #tpu.core_type<tc>, window_params = [{transform_indices = @transform_0, window_bounds = array<i64: 8, 784>}, {transform_indices = @transform_1, window_bounds = array<i64: 8, 8>}, {pipeline_mode = #tpu.pipeline_mode<synchronous>, transform_indices = @transform_2, window_bounds = array<i64: 784, 64>}, {pipeline_mode = #tpu.pipeline_mode<synchronous>, transform_indices = @transform_3, window_bounds = array<i64: 1, 64>}, {pipeline_mode = #tpu.pipeline_mode<synchronous>, transform_indices = @transform_4, window_bounds = array<i64: 64, 32>}, {pipeline_mode = #tpu.pipeline_mode<synchronous>, transform_indices = @transform_5, window_bounds = array<i64: 1, 32>}, {pipeline_mode = #tpu.pipeline_mode<synchronous>, transform_indices = @transform_6, window_bounds = array<i64: 32, 16>}, {pipeline_mode = #tpu.pipeline_mode<synchronous>, transform_indices = @transform_7, window_bounds = array<i64: 1, 16>}, {pipeline_mode = #tpu.pipeline_mode<synchronous>, transform_indices = @transform_8, window_bounds = array<i64: 16, 32>}, {pipeline_mode = #tpu.pipeline_mode<synchronous>, transform_indices = @transform_9, window_bounds = array<i64: 1, 32>}, {pipeline_mode = #tpu.pipeline_mode<synchronous>, transform_indices = @transform_10, window_bounds = array<i64: 32, 64>}, {pipeline_mode = #tpu.pipeline_mode<synchronous>, transform_indices = @transform_11, window_bounds = array<i64: 1, 64>}, {pipeline_mode = #tpu.pipeline_mode<synchronous>, transform_indices = @transform_12, window_bounds = array<i64: 64, 784>}, {pipeline_mode = #tpu.pipeline_mode<synchronous>, transform_indices = @transform_13, window_bounds = array<i64: 1, 784>}, {transform_indices = @transform_14, window_bounds = array<i64: 8, 784>}, {transform_indices = @transform_15, window_bounds = array<i64: 8, 16>}]} {
    %c0 = arith.constant 0 : index
    %c0_0 = arith.constant 0 : index
    %0 = vector.load %arg1[%c0, %c0_0] : memref<8x784xf32, #tpu.memory_space<vmem>>, vector<8x784xf32>
    %1 = arith.truncf %0 : vector<8x784xf32> to vector<8x784xbf16>
    %c0_1 = arith.constant 0 : index
    %c0_2 = arith.constant 0 : index
    %2 = vector.load %arg3[%c0_1, %c0_2] : memref<784x64xbf16, #tpu.memory_space<vmem>>, vector<784x64xbf16>
    %cst = arith.constant dense<0.000000e+00> : vector<8x64xf32>
    %3 = tpu.matmul %1, %2, %cst {dimension_numbers = #tpu.dot_dimension_numbers<[1], [0], [0], [1], [0, 0, 1, 1], [], []>} : vector<8x784xbf16>, vector<784x64xbf16>, vector<8x64xf32> -> vector<8x64xf32>
    %c0_3 = arith.constant 0 : index
    %c0_4 = arith.constant 0 : index
    %4 = vector.load %arg4[%c0_3, %c0_4] : memref<1x64xf32, #tpu.memory_space<vmem>>, vector<1x64xf32>
    %5 = vector.broadcast %4 : vector<1x64xf32> to vector<8x64xf32>
    %6 = arith.addf %3, %5 : vector<8x64xf32>
    %cst_5 = arith.constant 0.000000e+00 : f32
    %7 = vector.broadcast %cst_5 : f32 to vector<8x64xf32>
    %8 = arith.maximumf %6, %7 : vector<8x64xf32>
    %9 = arith.truncf %8 : vector<8x64xf32> to vector<8x64xbf16>
    %c0_6 = arith.constant 0 : index
    %c0_7 = arith.constant 0 : index
    %10 = vector.load %arg5[%c0_6, %c0_7] : memref<64x32xbf16, #tpu.memory_space<vmem>>, vector<64x32xbf16>
    %cst_8 = arith.constant dense<0.000000e+00> : vector<8x32xf32>
    %11 = tpu.matmul %9, %10, %cst_8 {dimension_numbers = #tpu.dot_dimension_numbers<[1], [0], [0], [1], [0, 0, 1, 1], [], []>} : vector<8x64xbf16>, vector<64x32xbf16>, vector<8x32xf32> -> vector<8x32xf32>
    %c0_9 = arith.constant 0 : index
    %c0_10 = arith.constant 0 : index
    %12 = vector.load %arg6[%c0_9, %c0_10] : memref<1x32xf32, #tpu.memory_space<vmem>>, vector<1x32xf32>
    %13 = vector.broadcast %12 : vector<1x32xf32> to vector<8x32xf32>
    %14 = arith.addf %11, %13 : vector<8x32xf32>
    %cst_11 = arith.constant 0.000000e+00 : f32
    %15 = vector.broadcast %cst_11 : f32 to vector<8x32xf32>
    %16 = arith.maximumf %14, %15 : vector<8x32xf32>
    %17 = arith.truncf %16 : vector<8x32xf32> to vector<8x32xbf16>
    %c0_12 = arith.constant 0 : index
    %c0_13 = arith.constant 0 : index
    %18 = vector.load %arg7[%c0_12, %c0_13] : memref<32x16xbf16, #tpu.memory_space<vmem>>, vector<32x16xbf16>
    %cst_14 = arith.constant dense<0.000000e+00> : vector<8x16xf32>
    %19 = tpu.matmul %17, %18, %cst_14 {dimension_numbers = #tpu.dot_dimension_numbers<[1], [0], [0], [1], [0, 0, 1, 1], [], []>} : vector<8x32xbf16>, vector<32x16xbf16>, vector<8x16xf32> -> vector<8x16xf32>
    %c0_15 = arith.constant 0 : index
    %c0_16 = arith.constant 0 : index
    %20 = vector.load %arg8[%c0_15, %c0_16] : memref<1x16xf32, #tpu.memory_space<vmem>>, vector<1x16xf32>
    %21 = vector.broadcast %20 : vector<1x16xf32> to vector<8x16xf32>
    %22 = arith.addf %19, %21 : vector<8x16xf32>
    %23 = vector.extract_strided_slice %22 {offsets = [0, 0], sizes = [8, 8], strides = [1, 1]} : vector<8x16xf32> to vector<8x8xf32>
    %24 = vector.extract_strided_slice %22 {offsets = [0, 8], sizes = [8, 8], strides = [1, 1]} : vector<8x16xf32> to vector<8x8xf32>
    %cst_17 = arith.constant 5.000000e-01 : f32
    %25 = vector.broadcast %cst_17 : f32 to vector<8x8xf32>
    %26 = arith.mulf %25, %24 : vector<8x8xf32>
    %27 = math.exp %26 : vector<8x8xf32>
    %c0_18 = arith.constant 0 : index
    %c0_19 = arith.constant 0 : index
    %28 = vector.load %arg2[%c0_18, %c0_19] : memref<8x8xf32, #tpu.memory_space<vmem>>, vector<8x8xf32>
    %29 = arith.mulf %28, %27 : vector<8x8xf32>
    %30 = arith.addf %29, %23 : vector<8x8xf32>
    %31 = arith.truncf %30 : vector<8x8xf32> to vector<8x8xbf16>
    %cst_20 = arith.constant 0.000000e+00 : bf16
    %32 = vector.broadcast %cst_20 : bf16 to vector<8x8xbf16>
    %33 = tpu.concatenate %31, %32 in 1 : vector<8x8xbf16>, vector<8x8xbf16> -> vector<8x16xbf16>
    %c0_21 = arith.constant 0 : index
    %c0_22 = arith.constant 0 : index
    %34 = vector.load %arg9[%c0_21, %c0_22] : memref<16x32xbf16, #tpu.memory_space<vmem>>, vector<16x32xbf16>
    %cst_23 = arith.constant dense<0.000000e+00> : vector<8x32xf32>
    %35 = tpu.matmul %33, %34, %cst_23 {dimension_numbers = #tpu.dot_dimension_numbers<[1], [0], [0], [1], [0, 0, 1, 1], [], []>} : vector<8x16xbf16>, vector<16x32xbf16>, vector<8x32xf32> -> vector<8x32xf32>
    %c0_24 = arith.constant 0 : index
    %c0_25 = arith.constant 0 : index
    %36 = vector.load %arg10[%c0_24, %c0_25] : memref<1x32xf32, #tpu.memory_space<vmem>>, vector<1x32xf32>
    %37 = vector.broadcast %36 : vector<1x32xf32> to vector<8x32xf32>
    %38 = arith.addf %35, %37 : vector<8x32xf32>
    %cst_26 = arith.constant 0.000000e+00 : f32
    %39 = vector.broadcast %cst_26 : f32 to vector<8x32xf32>
    %40 = arith.maximumf %38, %39 : vector<8x32xf32>
    %41 = arith.truncf %40 : vector<8x32xf32> to vector<8x32xbf16>
    %c0_27 = arith.constant 0 : index
    %c0_28 = arith.constant 0 : index
    %42 = vector.load %arg11[%c0_27, %c0_28] : memref<32x64xbf16, #tpu.memory_space<vmem>>, vector<32x64xbf16>
    %cst_29 = arith.constant dense<0.000000e+00> : vector<8x64xf32>
    %43 = tpu.matmul %41, %42, %cst_29 {dimension_numbers = #tpu.dot_dimension_numbers<[1], [0], [0], [1], [0, 0, 1, 1], [], []>} : vector<8x32xbf16>, vector<32x64xbf16>, vector<8x64xf32> -> vector<8x64xf32>
    %c0_30 = arith.constant 0 : index
    %c0_31 = arith.constant 0 : index
    %44 = vector.load %arg12[%c0_30, %c0_31] : memref<1x64xf32, #tpu.memory_space<vmem>>, vector<1x64xf32>
    %45 = vector.broadcast %44 : vector<1x64xf32> to vector<8x64xf32>
    %46 = arith.addf %43, %45 : vector<8x64xf32>
    %cst_32 = arith.constant 0.000000e+00 : f32
    %47 = vector.broadcast %cst_32 : f32 to vector<8x64xf32>
    %48 = arith.maximumf %46, %47 : vector<8x64xf32>
    %49 = arith.truncf %48 : vector<8x64xf32> to vector<8x64xbf16>
    %c0_33 = arith.constant 0 : index
    %c0_34 = arith.constant 0 : index
    %50 = vector.load %arg13[%c0_33, %c0_34] : memref<64x784xbf16, #tpu.memory_space<vmem>>, vector<64x784xbf16>
    %cst_35 = arith.constant dense<0.000000e+00> : vector<8x784xf32>
    %51 = tpu.matmul %49, %50, %cst_35 {dimension_numbers = #tpu.dot_dimension_numbers<[1], [0], [0], [1], [0, 0, 1, 1], [], []>} : vector<8x64xbf16>, vector<64x784xbf16>, vector<8x784xf32> -> vector<8x784xf32>
    %c0_36 = arith.constant 0 : index
    %c0_37 = arith.constant 0 : index
    %52 = vector.load %arg14[%c0_36, %c0_37] : memref<1x784xf32, #tpu.memory_space<vmem>>, vector<1x784xf32>
    %53 = vector.broadcast %52 : vector<1x784xf32> to vector<8x784xf32>
    %54 = arith.addf %51, %53 : vector<8x784xf32>
    %cst_38 = arith.constant 5.000000e-01 : f32
    %55 = vector.broadcast %cst_38 : f32 to vector<8x784xf32>
    %56 = arith.mulf %55, %54 : vector<8x784xf32>
    %57 = math.tanh %56 : vector<8x784xf32>
    %cst_39 = arith.constant 1.000000e+00 : f32
    %58 = vector.broadcast %cst_39 : f32 to vector<8x784xf32>
    %59 = arith.addf %57, %58 : vector<8x784xf32>
    %cst_40 = arith.constant 5.000000e-01 : f32
    %60 = vector.broadcast %cst_40 : f32 to vector<8x784xf32>
    %61 = arith.mulf %60, %59 : vector<8x784xf32>
    %c0_41 = arith.constant 0 : index
    %c0_42 = arith.constant 0 : index
    %62 = vector.load %arg15[%c0_41, %c0_42] : memref<8x784xf32, #tpu.memory_space<vmem>>, vector<8x784xf32>
    tpu.vector_store %arg15[%c0_41, %c0_42], %61 {strides = array<i32>} : memref<8x784xf32, #tpu.memory_space<vmem>>, vector<8x784xf32>,
    %c0_43 = arith.constant 0 : index
    %c0_44 = arith.constant 0 : index
    %63 = vector.load %arg16[%c0_43, %c0_44] : memref<8x16xf32, #tpu.memory_space<vmem>>, vector<8x16xf32>
    tpu.vector_store %arg16[%c0_43, %c0_44], %22 {strides = array<i32>} : memref<8x16xf32, #tpu.memory_space<vmem>>, vector<8x16xf32>,
    return
  }
  func.func @transform_0(%arg0: i32) -> (i32, i32) {
    %c0_i32 = arith.constant 0 : i32
    %c0_i32_0 = arith.constant 0 : i32
    return %arg0, %c0_i32 : i32, i32
  }
  func.func @transform_1(%arg0: i32) -> (i32, i32) {
    %c0_i32 = arith.constant 0 : i32
    %c0_i32_0 = arith.constant 0 : i32
    return %arg0, %c0_i32 : i32, i32
  }
  func.func @transform_2(%arg0: i32) -> (i32, i32) {
    %c0_i32 = arith.constant 0 : i32
    %c0_i32_0 = arith.constant 0 : i32
    %c0_i32_1 = arith.constant 0 : i32
    return %c0_i32, %c0_i32_0 : i32, i32
  }
  func.func @transform_3(%arg0: i32) -> (i32, i32) {
    %c0_i32 = arith.constant 0 : i32
    %c0_i32_0 = arith.constant 0 : i32
    %c0_i32_1 = arith.constant 0 : i32
    return %c0_i32, %c0_i32_0 : i32, i32
  }
  func.func @transform_4(%arg0: i32) -> (i32, i32) {
    %c0_i32 = arith.constant 0 : i32
    %c0_i32_0 = arith.constant 0 : i32
    %c0_i32_1 = arith.constant 0 : i32
    return %c0_i32, %c0_i32_0 : i32, i32
  }
  func.func @transform_5(%arg0: i32) -> (i32, i32) {
    %c0_i32 = arith.constant 0 : i32
    %c0_i32_0 = arith.constant 0 : i32
    %c0_i32_1 = arith.constant 0 : i32
    return %c0_i32, %c0_i32_0 : i32, i32
  }
  func.func @transform_6(%arg0: i32) -> (i32, i32) {
    %c0_i32 = arith.constant 0 : i32
    %c0_i32_0 = arith.constant 0 : i32
    %c0_i32_1 = arith.constant 0 : i32
    return %c0_i32, %c0_i32_0 : i32, i32
  }
  func.func @transform_7(%arg0: i32) -> (i32, i32) {
    %c0_i32 = arith.constant 0 : i32
    %c0_i32_0 = arith.constant 0 : i32
    %c0_i32_1 = arith.constant 0 : i32
    return %c0_i32, %c0_i32_0 : i32, i32
  }
  func.func @transform_8(%arg0: i32) -> (i32, i32) {
    %c0_i32 = arith.constant 0 : i32
    %c0_i32_0 = arith.constant 0 : i32
    %c0_i32_1 = arith.constant 0 : i32
    return %c0_i32, %c0_i32_0 : i32, i32
  }
  func.func @transform_9(%arg0: i32) -> (i32, i32) {
    %c0_i32 = arith.constant 0 : i32
    %c0_i32_0 = arith.constant 0 : i32
    %c0_i32_1 = arith.constant 0 : i32
    return %c0_i32, %c0_i32_0 : i32, i32
  }
  func.func @transform_10(%arg0: i32) -> (i32, i32) {
    %c0_i32 = arith.constant 0 : i32
    %c0_i32_0 = arith.constant 0 : i32
    %c0_i32_1 = arith.constant 0 : i32
    return %c0_i32, %c0_i32_0 : i32, i32
  }
  func.func @transform_11(%arg0: i32) -> (i32, i32) {
    %c0_i32 = arith.constant 0 : i32
    %c0_i32_0 = arith.constant 0 : i32
    %c0_i32_1 = arith.constant 0 : i32
    return %c0_i32, %c0_i32_0 : i32, i32
  }
  func.func @transform_12(%arg0: i32) -> (i32, i32) {
    %c0_i32 = arith.constant 0 : i32
    %c0_i32_0 = arith.constant 0 : i32
    %c0_i32_1 = arith.constant 0 : i32
    return %c0_i32, %c0_i32_0 : i32, i32
  }
  func.func @transform_13(%arg0: i32) -> (i32, i32) {
    %c0_i32 = arith.constant 0 : i32
    %c0_i32_0 = arith.constant 0 : i32
    %c0_i32_1 = arith.constant 0 : i32
    return %c0_i32, %c0_i32_0 : i32, i32
  }
  func.func @transform_14(%arg0: i32) -> (i32, i32) {
    %c0_i32 = arith.constant 0 : i32
    %c0_i32_0 = arith.constant 0 : i32
    return %arg0, %c0_i32 : i32, i32
  }
  func.func @transform_15(%arg0: i32) -> (i32, i32) {
    %c0_i32 = arith.constant 0 : i32
    %c0_i32_0 = arith.constant 0 : i32
    return %arg0, %c0_i32 : i32, i32
  }
}

</mosaic_0001>

<bundles_post_ra>
// kernel: tpu_custom_call.1
= control target key start
LH: loop header
LB: loop body
LE: loop exit
PB: predicated region body
PF: predicated region fallthrough
CT: control target
= control target key end

     0   :  { %21 = vsyncpa [#allocation3], 0  ;;  %v1770_v44 = vmov 0.0   ;;  %vm1771_vm0 = vmmov 0   ;;  %vm465_vm1 = vcmask 130048   ;;  %s2199_s0 = inlined_call_operand.vmem [shape: f32[8,784], index: 0, kind: input, shape index: {}]   ;;  %s2200_s1 = inlined_call_operand.vmem [shape: f32[8,8], index: 1, kind: input, shape index: {}]   ;;  %s2201_s2 = inlined_call_operand.vmem [shape: bf16[784,64], index: 2, kind: input, shape index: {}]   ;;  %s2202_s3 = inlined_call_operand.vmem [shape: f32[1,64], index: 3, kind: input, shape index: {}]   ;;  %s2203_s4 = inlined_call_operand.vmem [shape: bf16[64,32], index: 4, kind: input, shape index: {}]   ;;  %s2204_s5 = inlined_call_operand.vmem [shape: f32[1,32], index: 5, kind: input, shape index: {}]   ;;  %s2205_s6 = inlined_call_operand.vmem [shape: bf16[32,16], index: 6, kind: input, shape index: {}]   ;;  %s2206_s7 = inlined_call_operand.vmem [shape: f32[1,16], index: 7, kind: input, shape index: {}]   ;;  %s2207_s8 = inlined_call_operand.vmem [shape: bf16[16,32], index: 8, kind: input, shape index: {}]   ;;  %s2208_s9 = inlined_call_operand.vmem [shape: f32[1,32], index: 9, kind: input, shape index: {}]   ;;  %s2209_s10 = inlined_call_operand.vmem [shape: bf16[32,64], index: 10, kind: input, shape index: {}]   ;;  %s2210_s11 = inlined_call_operand.vmem [shape: f32[1,64], index: 11, kind: input, shape index: {}]   ;;  %s2211_s12 = inlined_call_operand.vmem [shape: bf16[64,784], index: 12, kind: input, shape index: {}]   ;;  %s2212_s13 = inlined_call_operand.vmem [shape: f32[1,784], index: 13, kind: input, shape index: {}]   ;;  %s2213_s14 = inlined_call_operand.hbm [shape: f32[8,784], index: 14, kind: output, shape index: {0}]   ;;  %s2214_s15 = inlined_call_operand.hbm [shape: f32[8,16], index: 15, kind: output, shape index: {1}]  }
   0x1   :  { %v1612_v0 = vld [vmem:[%s2201_s2 + $0x78] sm:$0xff]   ;;  %v1616_v4 = vld [vmem:[%s2201_s2 + $0x70] sm:$0xff]   ;;  %v1620_v8 = vld [vmem:[%s2201_s2 + $0x68] sm:$0xff]  }
   0x2   :  { %v1613_v1 = vld [vmem:[%s2201_s2 + $0x38] sm:$0xff]   ;;  %1468 = vmatprep.subr.bf16.mxu0 %v1612_v0  ;;  %v1617_v5 = vld [vmem:[%s2201_s2 + $0x30] sm:$0xff]   ;;  %v1621_v9 = vld [vmem:[%s2201_s2 + $0x28] sm:$0xff]  }
   0x3   :  { %v1614_v2 = vld [vmem:[%s2201_s2 + $0xf8] sm:$0xff]   ;;  %1469 = vmatpush3.bf16.msra.mxu0 %v1613_v1  ;;  %v1618_v6 = vld [vmem:[%s2201_s2 + $0xf0] sm:$0xff]   ;;  %v1622_v10 = vld [vmem:[%s2201_s2 + $0xe8] sm:$0xff]  }
   0x4   :  { %v1615_v3 = vld [vmem:[%s2201_s2 + $0xb8] sm:$0xff]   ;;  %1490 = vmatprep.subr.bf16.mxu1 %v1614_v2  ;;  %1470 = vmatprep.subr.bf16.mxu0 %v1616_v4  ;;  %v1619_v7 = vld [vmem:[%s2201_s2 + $0xb0] sm:$0xff]   ;;  %v1623_v11 = vld [vmem:[%s2201_s2 + $0xa8] sm:$0xff]  }
   0x5   :  { %1491 = vmatpush3.bf16.msra.mxu1 %v1615_v3  ;;  %v1624_v12 = vld [vmem:[%s2201_s2 + $0x60] sm:$0xff]   ;;  %v1628_v16 = vld [vmem:[%s2201_s2 + $0x58] sm:$0xff]   ;;  %v1632_v20 = vld [vmem:[%s2201_s2 + $0x50] sm:$0xff]  }
   0x6   :  { %1492 = vmatprep.subr.bf16.mxu1 %v1618_v6  ;;  %v1625_v13 = vld [vmem:[%s2201_s2 + $0x20] sm:$0xff]   ;;  %v1629_v17 = vld [vmem:[%s2201_s2 + $0x18] sm:$0xff]   ;;  %v1633_v21 = vld [vmem:[%s2201_s2 + $0x10] sm:$0xff]  }
   0x7   :  { %1471 = vmatpush3.bf16.msra.mxu0 %v1617_v5  ;;  %v1626_v14 = vld [vmem:[%s2201_s2 + $0xe0] sm:$0xff]   ;;  %v1630_v18 = vld [vmem:[%s2201_s2 + $0xd8] sm:$0xff]   ;;  %v1634_v22 = vld [vmem:[%s2201_s2 + $0xd0] sm:$0xff]  }
   0x8   :  { %1472 = vmatprep.subr.bf16.mxu0 %v1620_v8  ;;  %v1627_v15 = vld [vmem:[%s2201_s2 + $0xa0] sm:$0xff]   ;;  %v1631_v19 = vld [vmem:[%s2201_s2 + $0x98] sm:$0xff]   ;;  %v1635_v23 = vld [vmem:[%s2201_s2 + $0x90] sm:$0xff]  }
   0x9   :  { %1493 = vmatpush3.bf16.msra.mxu1 %v1619_v7  ;;  %v1636_v24 = vld [vmem:[%s2201_s2 + $0x48] sm:$0xff]   ;;  %v1640_v28 = vld [vmem:[%s2201_s2 + $0x40] sm:$0xff]   ;;  %v1644_v36 = vld [vmem:[%s2201_s2 + $0x178] sm:$0xff]  }
   0xa   :  { %1494 = vmatprep.subr.bf16.mxu1 %v1622_v10  ;;  %v1637_v25 = vld [vmem:[%s2201_s2 + $0x8] sm:$0xff]   ;;  %v1641_v29 = vld [vmem:[%s2201_s2] sm:$0xff]   ;;  %v55_v37 = vld [vmem:[%s2199_s0 + $0x18] sm:$0xff] }
   0xb   :  { %1473 = vmatpush3.bf16.msra.mxu0 %v1621_v9  ;;  %v1638_v26 = vld [vmem:[%s2201_s2 + $0xc8] sm:$0xff]   ;;  %v1642_v30 = vld [vmem:[%s2201_s2 + $0xc0] sm:$0xff]   ;;  %v62_v38 = vpack.c.bf16 %v55_v37, %v55_v37  ;;  %v1645_v39 = vld [vmem:[%s2201_s2 + $0x138] sm:$0xff]  }
   0xc   :  { %1474 = vmatprep.subr.bf16.mxu0 %v1624_v12  ;;  %v1639_v27 = vld [vmem:[%s2201_s2 + $0x88] sm:$0xff]   ;;  %v1643_v33 = vld [vmem:[%s2201_s2 + $0x80] sm:$0xff]   ;;  %v54_v40 = vld [vmem:[%s2199_s0 + $0x10] sm:$0xff] }
   0xd   :  { %1495 = vmatpush3.bf16.msra.mxu1 %v1623_v11  ;;  %v53_v31 = vld [vmem:[%s2199_s0 + $0x8] sm:$0xff]  ;;  %v52_v34 = vld [vmem:[%s2199_s0] sm:$0xff]  ;;  %541 = vmatprep.mubr.bf16.mxu1 %v62_v38  ;;  %v61_v41 = vpack.c.bf16 %v54_v40, %v54_v40  ;;  %v1646_v42 = vld [vmem:[%s2201_s2 + $0x170] sm:$0xff]  }
   0xe   :  { %1496 = vmatprep.subr.bf16.mxu1 %v1626_v14  ;;  %v60_v32 = vpack.c.bf16 %v53_v31, %v53_v31  ;;  %v59_v35 = vpack.c.bf16 %v52_v34, %v52_v34  ;;  %v1647_v43 = vld [vmem:[%s2201_s2 + $0x130] sm:$0xff]   ;;  %v1648_v45 = vld [vmem:[%s2201_s2 + $0x168] sm:$0xff]   ;;  %v1650_v47 = vld [vmem:[%s2201_s2 + $0x160] sm:$0xff]  }
   0xf   :  { %1475 = vmatpush3.bf16.msra.mxu0 %v1625_v13  ;;  %v1649_v46 = vld [vmem:[%s2201_s2 + $0x128] sm:$0xff]   ;;  %v1651_v48 = vld [vmem:[%s2201_s2 + $0x120] sm:$0xff]   ;;  %v1652_v49 = vld [vmem:[%s2201_s2 + $0x158] sm:$0xff]  }
  0x10   :  { %1476 = vmatprep.subr.bf16.mxu0 %v1628_v16  ;;  %501 = vmatprep.mubr.bf16.mxu0 %v60_v32  ;;  %v1653_v50 = vld [vmem:[%s2201_s2 + $0x118] sm:$0xff]   ;;  %v1654_v51 = vld [vmem:[%s2201_s2 + $0x150] sm:$0xff]   ;;  %v1660_v53 = vld [vmem:[%s2201_s2 + $0x180] sm:$0xff]  }
  0x11   :  { %1497 = vmatpush3.bf16.msra.mxu1 %v1627_v15  ;;  %v1655_v52 = vld [vmem:[%s2201_s2 + $0x110] sm:$0xff]   ;;  %v57_v54 = vld [vmem:[%s2199_s0 + $0x28] sm:$0xff]  ;;  %v1658_v60 = vld [vmem:[%s2201_s2 + $0x140] sm:$0xff]  }
  0x12   :  { %1498 = vmatprep.subr.bf16.mxu1 %v1630_v18  ;;  %v1656_v55 = vld [vmem:[%s2201_s2 + $0x148] sm:$0xff]   ;;  %v64_v56 = vpack.c.bf16 %v57_v54, %v57_v54  ;;  %v58_v57 = vld [vmem:[%s2199_s0 + $0x30] sm:$0xff]  ;;  %v1659_v61 = vld [vmem:[%s2201_s2 + $0x100] sm:$0xff]  }
  0x13   :  { %1477 = vmatpush3.bf16.msra.mxu0 %v1629_v17  ;;  %v65_v58 = vpack.c.bf16 %v58_v57, %v58_v57  ;;  %v1657_v59 = vld [vmem:[%s2201_s2 + $0x108] sm:$0xff]   ;;  %v56_v62 = vld [vmem:[%s2199_s0 + $0x20] sm:$0xff] }
  0x14   :  { %1478 = vmatprep.subr.bf16.mxu0 %v1632_v20  ;;  %v63_v63 = vpack.c.bf16 %v56_v62, %v56_v62 }
  0x15   :  { %1499 = vmatpush3.bf16.msra.mxu1 %v1631_v19 }
  0x16   :  { %1500 = vmatprep.subr.bf16.mxu1 %v1634_v22 }
  0x17   :  { %1479 = vmatpush3.bf16.msra.mxu0 %v1633_v21 }
  0x18   :  { %1480 = vmatprep.subr.bf16.mxu0 %v1636_v24 }
  0x19   :  { %1501 = vmatpush3.bf16.msra.mxu1 %v1635_v23 }
  0x1a   :  { %1502 = vmatprep.subr.bf16.mxu1 %v1638_v26 }
  0x1b   :  { %1481 = vmatpush3.bf16.msra.mxu0 %v1637_v25 }
  0x1c   :  { %1482 = vmatprep.subr.bf16.mxu0 %v1640_v28 }
  0x1d   :  { %1503 = vmatpush3.bf16.msra.mxu1 %v1639_v27 }
  0x1e   :  { %1504 = vmatprep.subr.bf16.mxu1 %v1642_v30 }
  0x1f   :  { %1483 = vmatpush3.bf16.msra.mxu0 %v1641_v29 }
  0x20   :  { %1512 = vmatprep.subr.bf16.mxu0 %v1644_v36 }
  0x21   :  { %1505 = vmatpush3.bf16.msra.mxu1 %v1643_v33 }
  0x22   :  { %502 = vmatmul.mubr.bf16.vlgmr.msra.gmra.mxu0 %v59_v35  ;;  %1554 = vmatprep.subr.bf16.mxu1 %v1770_v44 }
  0x23   :  { %1513 = vmatpush3.bf16.msra.mxu0 %v1645_v39  ;;  %581 = vmatprep.mubr.bf16.mxu0 %v64_v56 }
  0x24   :  { %542 = vmatmul.mubr.bf16.vlgmr.msra.gmra.mxu1 %v61_v41  ;;  %1514 = vmatprep.subr.bf16.mxu0 %v1646_v42 }
  0x25   :  { %1556 = vmatprep.mubr.msk.bf16.mxu1 %vm1771_vm0, %v1770_v44  ;;  %1555 = vmatpush3.bf16.msra.mxu1 %v1660_v53 }
  0x26   :  { %1560 = vmatprep.subr.bf16.mxu1 %v1770_v44 }
  0x27   :  { %1515 = vmatpush3.bf16.msra.mxu0 %v1647_v43 }
  0x28   :  { %1516 = vmatprep.subr.bf16.mxu0 %v1648_v45 }
  0x2b   :  { %1517 = vmatpush3.bf16.msra.mxu0 %v1649_v46 }
  0x2c   :  { %1518 = vmatprep.subr.bf16.mxu0 %v1650_v47  ;;  %1557 = vmatmul.mubr.msk.bf16.vlgmr.msra.gmra.mxu1 %vm465_vm1, %v65_v58 }
  0x2d   :  { %1568 = vmatprep.mubr.msk.bf16.mxu1 %vm1771_vm0, %v1770_v44 }
  0x2f   :  { %1519 = vmatpush3.bf16.msra.mxu0 %v1651_v48 }
  0x30   :  { %1520 = vmatprep.subr.bf16.mxu0 %v1652_v49 }
  0x33   :  { %1521 = vmatpush3.bf16.msra.mxu0 %v1653_v50 }
  0x34   :  { %1522 = vmatprep.subr.bf16.mxu0 %v1654_v51 }
  0x37   :  { %1523 = vmatpush3.bf16.msra.mxu0 %v1655_v52 }
  0x38   :  { %1524 = vmatprep.subr.bf16.mxu0 %v1656_v55 }
  0x3b   :  { %1525 = vmatpush3.bf16.msra.mxu0 %v1657_v59 }
  0x3c   :  { %1526 = vmatprep.subr.bf16.mxu0 %v1658_v60 }
  0x3f   :  { %1527 = vmatpush3.bf16.msra.mxu0 %v1659_v61 }
  0x40   :  { %1580 = vmatprep.subr.bf16.mxu0 %v1770_v44 }
  0x42   :  { %582 = vmatmul.mubr.bf16.vlgmr.msra.gmra.mxu0 %v63_v63 }
  0x43   :  { %1582 = vmatprep.mubr.msk.bf16.mxu0 %vm1771_vm0, %v1770_v44 }
  0x44   :  { %22 = vsyncpa [#allocation5], 0  ;;  %v1661_v0 = vld [vmem:[%s2203_s4 + $0x18] sm:$0xff]   ;;  %v1662_v1 = vld [vmem:[%s2203_s4 + $0x10] sm:$0xff]   ;;  %vm670_vm2 = vcmask 523264   ;;  %vm739_vm3 = vcmask 261120  }
  0x45   :  { %1561 = vmatpush3.bf16.msra.mxu1 %v1661_v0  ;;  %v1663_v2 = vld [vmem:[%s2203_s4 + $0x8] sm:$0xff]   ;;  %v1664_v3 = vld [vmem:[%s2203_s4] sm:$0xff]   ;;  %vm794_vm4 = vcmask 64512   ;;  %v1675_v61 = vld [vmem:[%s2211_s12 + $0xb4] ss:$28 sps:$4 sm:$0xff]   ;;  %s1774_s4 = smov [#allocation4]  }
  0x46   :  { %1562 = vmatprep.subr.bf16.mxu1 %v1770_v44  ;;  %v1368_v17 = vld [vmem:[%s2202_s3] ss:$0 sm:$0xff]  ;;  %v1665_v29 = vld [vmem:[%s2205_s6 + $0x8] sm:$0xff]   ;;  %v1678_v62 = vld [vmem:[%s2211_s12 + $0x74] ss:$28 sps:$4 sm:$0xff]  }
  0x47   :  { %v1666_v31 = vld [vmem:[%s2205_s6] sm:$0xff]   ;;  %v1668_v50 = vld [vmem:[%s2209_s10 + $0x8] sm:$0xff]   ;;  %v1684_v0 = vld [vmem:[%s2211_s12 + $0x3c] ss:$28 sps:$4 sm:$0xff]  }
  0x48   :  { %v1419_v32 = vld [vmem:[%s2204_s5] ss:$0 sm:$0xff]  ;;  %v1670_v59 = vld [vmem:[%s2211_s12 + $0xa8] ss:$28 sps:$4 sm:$0xff]   ;;  %v1676_v63 = vld [vmem:[%s2211_s12 + $0x70] ss:$28 sps:$4 sm:$0xff]  }
  0x49   :  { %1563 = vmatpush3.bf16.msra.mxu1 %v1662_v1  ;;  %v1425_v40 = vld [vmem:[%s2206_s7] ss:$0 sm:$0xff]  ;;  %s1772_s7 = smov 120   ;;  %v1672_v60 = vld [vmem:[%s2211_s12 + $0xac] ss:$28 sps:$4 sm:$0xff]  }
  0x4a   :  { %1564 = vmatprep.subr.bf16.mxu1 %v1770_v44  ;;  %v1667_v49 = vld [vmem:[%s2207_s8] sm:$0xff]   ;;  %v1682_v1 = vld [vmem:[%s2211_s12 + $0x38] ss:$28 sps:$4 sm:$0xff]  }
  0x4b   :  { %1581 = vmatpush3.bf16.msra.mxu0 %v1667_v49  ;;  %v786_v52 = vld [vmem:[%s2200_s1] sm:$0xff] }
  0x4c   :  { %v1669_v58 = vld [vmem:[%s2209_s10] sm:$0xff]   ;;  %1149 = vmatprep.subr.bf16.mxu0 %v1672_v60  ;;  %s1356_s10 = sshll.u32 %s1774_s4, 4  ;;  %s1357_s10 = int_to_ptr.vmem [resolvable:$true] %s1356_s10 }
  0x4d   :  { %1565 = vmatpush3.bf16.msra.mxu1 %v1663_v2  ;;  %v1429_v2 = vld [vmem:[%s2208_s9] ss:$0 sm:$0xff]  ;;  %s1726_s18 = scalar_lea.vmem %s1357_s10, 128  ;;  %p1731_p1 = scmp.lt.s32.totalorder %s1357_s10, %s1357_s10 }
  0x4e   :  { %1566 = vmatprep.subr.bf16.mxu1 %v1770_v44  ;;  %p1727_p0 = scmp.ne.s32.totalorder %s1357_s10, %s1726_s18  ;;  %p1732_p2 = scmp.lt.s32.totalorder %s1726_s18, %s1726_s18 }
  0x50   :  { %p1733_p3 = por %p1732_p2, %p1731_p1 }
  0x51   :  { %1567 = vmatpush3.bf16.msra.mxu1 %v1664_v3 }
  0x52   :  { %1572 = vmatprep.subr.bf16.mxu1 %v1770_v44  ;;  %p1734_p4 = pnand %p1733_p3, %p1727_p0 }
  0xe2   :  { %v1484_v4 = vpop.f32.mrf.mxu0 }
  0xe4   :  { %v1485_v5 = vpop.f32.mrf.mxu0  ;;  %v1506_v6 = vpop.f32.mrf.mxu1 }
  0xe5   :  { %v1486_v16 = vadd.f32 %v1485_v5, %v1484_v4 }
  0xe6   :  { %v1487_v7 = vpop.f32.mrf.mxu0  ;;  %v1507_v8 = vpop.f32.mrf.mxu1 }
  0xe7   :  { %v504_v18 = vadd.f32 %v1486_v16, %v1368_v17  ;;  %v1508_v19 = vadd.f32 %v1507_v8, %v1506_v6  ;;  %v1673_v8 = vld [vmem:[%s2211_s12 + $0xb0] ss:$28 sps:$4 sm:$0xff]   ;;  %v1688_v17 = vld [vmem:[%s2211_s12] ss:$28 sps:$4 sm:$0xff]  }
  0xe8   :  { %v1488_v9 = vpop.f32.mrf.mxu0  ;;  %v1509_v10 = vpop.f32.mrf.mxu1  ;;  %v1693_v16 = vld [vmem:[%s2211_s12 + $0xc] ss:$28 sps:$4 sm:$0xff]  }
  0xe9   :  { %v544_v22 = vadd.f32 %v1508_v19, %v504_v18  ;;  %v1681_v10 = vld [vmem:[%s2211_s12 + $0x7c] ss:$28 sps:$4 sm:$0xff]   ;;  %v1691_v18 = vld [vmem:[%s2211_s12 + $0x8] ss:$28 sps:$4 sm:$0xff]  }
  0xea   :  { %v1510_v11 = vpop.f32.mrf.mxu1  ;;  %v1696_v19 = vld [vmem:[%s2211_s12 + $0xbc] ss:$28 sps:$4 sm:$0xff]  }
  0xec   :  { %v623_v12 = vpop.f32.mrf.mxu1 }
  0xee   :  { %v1558_v13 = vpop.f32.mrf.mxu1 }
  0xef   :  { %v1687_v13 = vld [vmem:[%s2211_s12 + $0x44] ss:$28 sps:$4 sm:$0xff]  }
  0xf0   :  { %v626_v14 = vpop.f32.mrf.mxu1 }
  0xf1   :  { %v1685_v14 = vld [vmem:[%s2211_s12 + $0x40] ss:$28 sps:$4 sm:$0xff]  }
  0xf2   :  { %v1559_v15 = vpop.f32.mrf.mxu1 }
  0xf3   :  { %v1690_v15 = vld [vmem:[%s2211_s12 + $0x4] ss:$28 sps:$4 sm:$0xff]  }
 0x102   :  { %v1528_v20 = vpop.f32.mrf.mxu0 }
 0x104   :  { %v1529_v21 = vpop.f32.mrf.mxu0 }
 0x105   :  { %v1530_v23 = vadd.f32 %v1529_v21, %v1528_v20  ;;  %v1773_v20 = vmov 0   ;;  %v1432_v21 = vld [vmem:[%s2210_s11] ss:$0 sm:$0xff] }
 0x106   :  { %v1531_v24 = vpop.f32.mrf.mxu0 }
 0x107   :  { %v584_v25 = vadd.f32 %v1530_v23, %v544_v22 }
 0x108   :  { %v1532_v26 = vpop.f32.mrf.mxu0 }
 0x109   :  { %v624_v27 = vadd.f32 %v623_v12, %v584_v25  ;;  %v1679_v12 = vld [vmem:[%s2211_s12 + $0x78] ss:$28 sps:$4 sm:$0xff]  }
 0x10b   :  { %v629_v28 = vmax.f32 %v624_v27, 0.0  ;;  %v1694_v27 = vld [vmem:[%s2211_s12 + $0xb8] ss:$28 sps:$4 sm:$0xff]  }
 0x10d   :  { %v630_v30 = vpack.c.bf16 %v629_v28, %v629_v28  ;;  %v1697_v28 = vld [vmem:[%s2211_s12 + $0xc0] ss:$28 sps:$4 sm:$0xff]  }
 0x10f   :  { %1569 = vmatmul.mubr.msk.bf16.vlgmr.msra.gmra.mxu1 %vm670_vm2, %v630_v30  ;;  %v1700_v30 = vld [vmem:[%s2211_s12 + $0x84] ss:$28 sps:$4 sm:$0xff]  }
 0x110   :  { %1573 = vmatpush3.bf16.msra.mxu1 %v1665_v29  ;;  %1576 = vmatprep.mubr.msk.bf16.mxu1 %vm1771_vm0, %v1770_v44 }
 0x111   :  { %1574 = vmatprep.subr.bf16.mxu1 %v1770_v44 }
 0x114   :  { %1575 = vmatpush3.bf16.msra.mxu1 %v1666_v31 }
 0x115   :  { %1586 = vmatprep.subr.bf16.mxu1 %v1770_v44 }
 0x1cf   :  { %v708_v33 = vpop.f32.mrf.mxu1 }
 0x1d0   :  { %v709_v34 = vadd.f32 %v1419_v32, %v708_v33  ;;  %v1698_v32 = vld [vmem:[%s2211_s12 + $0x80] ss:$28 sps:$4 sm:$0xff]   ;;  %v1701_v33 = vld [vmem:[%s2211_s12 + $0x88] ss:$28 sps:$4 sm:$0xff]  }
 0x1d1   :  { %v1570_v35 = vpop.f32.mrf.mxu1 }
 0x1d2   :  { %v714_v36 = vmax.f32 %v709_v34, 0.0  ;;  %v1704_v34 = vld [vmem:[%s2211_s12 + $0x4c] ss:$28 sps:$4 sm:$0xff]  }
 0x1d3   :  { %v711_v37 = vpop.f32.mrf.mxu1  ;;  %v1702_v35 = vld [vmem:[%s2211_s12 + $0x48] ss:$28 sps:$4 sm:$0xff]  }
 0x1d4   :  { %v715_v38 = vpack.c.bf16 %v714_v36, %v714_v36  ;;  %v1705_v36 = vld [vmem:[%s2211_s12 + $0x50] ss:$28 sps:$4 sm:$0xff]  }
 0x1d5   :  { %v1571_v39 = vpop.f32.mrf.mxu1  ;;  %v1708_v37 = vld [vmem:[%s2211_s12 + $0x14] ss:$28 sps:$4 sm:$0xff]  }
 0x1d6   :  { %1577 = vmatmul.mubr.msk.bf16.vlgmr.msra.gmra.mxu1 %vm739_vm3, %v715_v38  ;;  %v1706_v38 = vld [vmem:[%s2211_s12 + $0x10] ss:$28 sps:$4 sm:$0xff]   ;;  %v1709_v39 = vld [vmem:[%s2211_s12 + $0x18] ss:$28 sps:$4 sm:$0xff]  }
 0x1d7   :  { %1590 = vmatprep.mubr.msk.bf16.mxu1 %vm1771_vm0, %v1770_v44  ;;  %1587 = vmatpush3.bf16.msra.mxu1 %v1668_v50 }
 0x1d8   :  { %1588 = vmatprep.subr.bf16.mxu1 %v1770_v44 }
 0x1db   :  { %1589 = vmatpush3.bf16.msra.mxu1 %v1669_v58 }
 0x1dc   :  { %1190 = vmatprep.subr.bf16.mxu1 %v1675_v61 }
 0x296   :  { %v777_v41 = vpop.f32.mrf.mxu1 }
 0x297   :  { %v778_v42 = vadd.f32 %v1425_v40, %v777_v41 }
 0x298   :  { %v1578_v43 = vpop.f32.mrf.mxu1 }
 0x299   :  { %v783_v45 = vmul.f32 0.5, %v778_v42  ;;  %1339 = vst.msk [vmem:[#allocation4] sm:$0xff] %vm465_vm1, %v778_v42 }
 0x29a   :  { %v780_v46 = vpop.f32.mrf.mxu1 }
 0x29b   :  { %v784_v47 = vmul.f32 1.442695, %v783_v45 }
 0x29c   :  { %v1579_v48 = vpop.f32.mrf.mxu1 }
 0x29d   :  { %1710 = vpow2.f32 %v784_v47 }
 0x2aa   :  { %v1711_v51 = vpop.eup %1710 }
 0x2ab   :  { %788 = vrot.lane.b32.xlu0 %v1711_v51, %s1772_s7 }
 0x31d   :  { %v789_v53 = vpop.permute.xlu0 %788 }
 0x31e   :  { %v791_v54 = vmul.f32 %v789_v53, %v786_v52 }
 0x320   :  { %v792_v55 = vadd.f32 %v791_v54, %v778_v42 }
 0x322   :  { %v793_v56 = vpack.c.bf16 %v792_v55, %v792_v55 }
 0x324   :  { %v797_v57 = vsel %vm794_vm4, %v793_v56, 0 }
 0x325   :  { %1583 = vmatmul.mubr.msk.bf16.vlgmr.msra.gmra.mxu0 %vm465_vm1, %v797_v57 }
 0x326   :  { %1150 = vmatpush1.bf16.msra.mxu0 %v1670_v59  ;;  %1173 = vmatprep.mubr.bf16.mxu0 %v1773_v20 }
 0x327   :  { %1151 = vmatprep.subr.bf16.mxu0 %v1678_v62 }
 0x32a   :  { %1152 = vmatpush1.bf16.msra.mxu0 %v1676_v63 }
 0x32b   :  { %1153 = vmatprep.subr.bf16.mxu0 %v1684_v0 }
 0x32e   :  { %1154 = vmatpush1.bf16.msra.mxu0 %v1682_v1 }
 0x32f   :  { %1155 = vmatprep.subr.bf16.mxu0 %v1690_v15 }
 0x332   :  { %1156 = vmatpush1.bf16.msra.mxu0 %v1688_v17 }
 0x333   :  { %1231 = vmatprep.subr.bf16.mxu0 %v1696_v19 }
 0x3e5   :  { %v849_v3 = vpop.f32.mrf.mxu0 }
 0x3e6   :  { %v850_v4 = vadd.f32 %v1429_v2, %v849_v3 }
 0x3e7   :  { %v1584_v5 = vpop.f32.mrf.mxu0 }
 0x3e8   :  { %v855_v6 = vmax.f32 %v850_v4, 0.0 }
 0x3e9   :  { %v852_v7 = vpop.f32.mrf.mxu0 }
 0x3ea   :  { %v856_v9 = vpack.c.bf16 %v855_v6, %v855_v6 }
 0x3eb   :  { %v1585_v11 = vpop.f32.mrf.mxu0 }
 0x3ec   :  { %1591 = vmatmul.mubr.msk.bf16.vlgmr.msra.gmra.mxu1 %vm739_vm3, %v856_v9 }
 0x3ed   :  { %1191 = vmatpush1.bf16.msra.mxu1 %v1673_v8  ;;  %1214 = vmatprep.mubr.bf16.mxu1 %v1773_v20 }
 0x3ee   :  { %1192 = vmatprep.subr.bf16.mxu1 %v1681_v10 }
 0x3f1   :  { %1193 = vmatpush1.bf16.msra.mxu1 %v1679_v12 }
 0x3f2   :  { %1194 = vmatprep.subr.bf16.mxu1 %v1687_v13 }
 0x3f5   :  { %1195 = vmatpush1.bf16.msra.mxu1 %v1685_v14 }
 0x3f6   :  { %1196 = vmatprep.subr.bf16.mxu1 %v1693_v16 }
 0x3f9   :  { %1197 = vmatpush1.bf16.msra.mxu1 %v1691_v18 }
 0x3fa   :  { %1594 = vmatprep.subr.bf16.mxu1 %v1770_v44 }
 0x4ac   :  { %v917_v22 = vpop.f32.mrf.mxu1 }
 0x4ad   :  { %v918_v23 = vadd.f32 %v1432_v21, %v917_v22 }
 0x4ae   :  { %v1592_v24 = vpop.f32.mrf.mxu1 }
 0x4af   :  { %v923_v25 = vmax.f32 %v918_v23, 0.0 }
 0x4b0   :  { %v920_v26 = vpop.f32.mrf.mxu1 }
 0x4b1   :  { %v924_v29 = vpack.c.bf16 %v923_v25, %v923_v25 }
 0x4b2   :  { %v1593_v31 = vpop.f32.mrf.mxu1 }
 0x4b3   :  { %1464 = vmatmul.mubr.msk.bf16.vlgmr.msra.gmra.mxu0 %vm670_vm2, %v924_v29  ;;  %1465 = vmatmul.mubr.msk.bf16.vlgmr.msra.gmra.mxu1 %vm670_vm2, %v924_v29 }
 0x4b4   :  { %1232 = vmatpush1.bf16.msra.mxu0 %v1694_v27  ;;  %1595 = vmatpush3.bf16.msra.mxu1 %v1697_v28 }
 0x4b5   :  { %1233 = vmatprep.subr.bf16.mxu0 %v1700_v30  ;;  %1596 = vmatprep.subr.bf16.mxu1 %v1770_v44 }
 0x4b6   :  { %1255 = vmatprep.mubr.bf16.mxu0 %v1773_v20  ;;  %1602 = vmatprep.mubr.msk.bf16.mxu1 %vm1771_vm0, %v1770_v44 }
 0x4b8   :  { %1234 = vmatpush1.bf16.msra.mxu0 %v1698_v32  ;;  %1597 = vmatpush3.bf16.msra.mxu1 %v1701_v33 }
 0x4b9   :  { %1235 = vmatprep.subr.bf16.mxu0 %v1704_v34  ;;  %1598 = vmatprep.subr.bf16.mxu1 %v1770_v44 }
 0x4bc   :  { %1236 = vmatpush1.bf16.msra.mxu0 %v1702_v35  ;;  %1599 = vmatpush3.bf16.msra.mxu1 %v1705_v36 }
 0x4bd   :  { %1237 = vmatprep.subr.bf16.mxu0 %v1708_v37  ;;  %1600 = vmatprep.subr.bf16.mxu1 %v1770_v44 }
 0x4c0   :  { %1238 = vmatpush1.bf16.msra.mxu0 %v1706_v38  ;;  %1601 = vmatpush3.bf16.msra.mxu1 %v1709_v39 }
 0x4c3   :  { %1466 = vmatmul.mubr.msk.bf16.vlgmr.msra.gmra.mxu0 %vm670_vm2, %v924_v29  ;;  %1603 = vmatmul.mubr.msk.bf16.vlgmr.msra.gmra.mxu1 %vm670_vm2, %v924_v29 }
 0x4c4   :  { %1737 = shalt.err (!%p1734_p4)
}
 0x4c5   :  { %1359 = dma.vmem_to_hbm [thread:$0]  %s1357_s10, 128, %s2214_s15, [#allocation5]   ;;  %v959_v44 = vlaneseq  ;;  %v957_v43 = vld [vmem:[%s2212_s13] sm:$0x7f] }
 0x4c6   :  { %s1775_s13 = smov [#allocation2]  }
 0x4c7   :  { %v960_v40 = vshrl.u32 %v959_v44, 7  ;;  %s1346_s15 = sshll.u32 %s1775_s13, 4  ;;  %s1347_s15 = int_to_ptr.vmem [resolvable:$true] %s1346_s15 }
 0x4c8   :  { %s1746_s21 = scalar_lea.vmem %s1347_s15, 896  ;;  %p1751_p6 = scmp.lt.s32.totalorder %s1347_s15, %s1347_s15 }
 0x4c9   :  { %v961_v41 = vsub.s32 0, %v960_v40  ;;  %v969_v42 = vsub.s32 2, %v960_v40  ;;  %v965_v45 = vsub.s32 1, %v960_v40  ;;  %v973_v46 = vsub.s32 3, %v960_v40  ;;  %p1747_p5 = scmp.ne.s32.totalorder %s1347_s15, %s1746_s21  ;;  %p1752_p7 = scmp.lt.s32.totalorder %s1746_s21, %s1746_s21 }
 0x4ca   :  { %v977_v3 = vsub.s32 4, %v960_v40  ;;  %v985_v4 = vsub.s32 6, %v960_v40  ;;  %v981_v5 = vsub.s32 5, %v960_v40 }
 0x4cb   :  { %v962_v47 = vrot.slane %v957_v43, %v961_v41  ;;  %v970_v48 = vrot.slane %v957_v43, %v969_v42  ;;  %v966_v49 = vrot.slane %v957_v43, %v965_v45  ;;  %v974_v50 = vrot.slane %v957_v43, %v973_v46  ;;  %p1753_p8 = por %p1752_p7, %p1751_p6 }
 0x4cc   :  { %v978_v6 = vrot.slane %v957_v43, %v977_v3  ;;  %v986_v7 = vrot.slane %v957_v43, %v985_v4  ;;  %v982_v8 = vrot.slane %v957_v43, %v981_v5 }
 0x4cd   :  { %p1754_p9 = pnand %p1753_p8, %p1747_p5 }
 0x573   :  { %v1175_v51 = vpop.f32.mrf.mxu0  ;;  %v1216_v52 = vpop.f32.mrf.mxu1 }
 0x574   :  { %v1176_v53 = vadd.f32 %v1175_v51, %v962_v47  ;;  %v1217_v54 = vadd.f32 %v1216_v52, %v970_v48 }
 0x575   :  { %v1177_v55 = vpop.f32.mrf.mxu0  ;;  %v1218_v56 = vpop.f32.mrf.mxu1 }
 0x576   :  { %v1304_v57 = vmul.f32 0.5, %v1176_v53  ;;  %v1306_v58 = vmul.f32 0.5, %v1217_v54  ;;  %v1178_v59 = vadd.f32 %v1177_v55, %v966_v49  ;;  %v1219_v60 = vadd.f32 %v1218_v56, %v974_v50 }
 0x577   :  { %v1179_v61 = vpop.f32.mrf.mxu0  ;;  %v1220_v62 = vpop.f32.mrf.mxu1 }
 0x578   :  { %1712 = vtanh.f32 %v1304_v57  ;;  %v1305_v63 = vmul.f32 0.5, %v1178_v59  ;;  %v1307_v0 = vmul.f32 0.5, %v1219_v60 }
 0x579   :  { %1714 = vtanh.f32 %v1306_v58  ;;  %v1180_v1 = vpop.f32.mrf.mxu0  ;;  %v1221_v2 = vpop.f32.mrf.mxu1 }
 0x57a   :  { %1716 = vtanh.f32 %v1305_v63 }
 0x57b   :  { %1718 = vtanh.f32 %v1307_v0 }
 0x583   :  { %v1257_v9 = vpop.f32.mrf.mxu0  ;;  %v1298_v10 = vpop.f32.mrf.mxu1 }
 0x584   :  { %v1258_v11 = vadd.f32 %v1257_v9, %v978_v6  ;;  %v1299_v12 = vadd.f32 %v1298_v10, %v986_v7 }
 0x585   :  { %v1713_v13 = vpop.eup %1712  ;;  %v1259_v14 = vpop.f32.mrf.mxu0 }
 0x586   :  { %v1604_v15 = vpop.f32.mrf.mxu1  ;;  %v1715_v16 = vpop.eup %1714  ;;  %v1318_v17 = vadd.f32 1.0, %v1713_v13  ;;  %v1308_v18 = vmul.f32 0.5, %v1258_v11  ;;  %v1310_v19 = vmul.f32 0.5, %v1299_v12  ;;  %v1260_v20 = vadd.f32 %v1259_v14, %v982_v8 }
 0x587   :  { %v1717_v21 = vpop.eup %1716  ;;  %v1320_v22 = vadd.f32 1.0, %v1715_v16  ;;  %v1261_v23 = vpop.f32.mrf.mxu0 }
 0x588   :  { %v1301_v24 = vpop.f32.mrf.mxu1  ;;  %v1719_v25 = vpop.eup %1718  ;;  %v1325_v26 = vmul.f32 0.5, %v1318_v17  ;;  %v1319_v27 = vadd.f32 1.0, %v1717_v21  ;;  %1720 = vtanh.f32 %v1308_v18  ;;  %v1309_v28 = vmul.f32 0.5, %v1260_v20 }
 0x589   :  { %v1327_v29 = vmul.f32 0.5, %v1320_v22  ;;  %v1321_v30 = vadd.f32 1.0, %v1719_v25  ;;  %1722 = vtanh.f32 %v1310_v19  ;;  %v1262_v31 = vpop.f32.mrf.mxu0 }
 0x58a   :  { %v1605_v32 = vpop.f32.mrf.mxu1  ;;  %1332 = vst [vmem:[#allocation2] sm:$0xff] %v1325_v26  ;;  %v1326_v33 = vmul.f32 0.5, %v1319_v27  ;;  %1724 = vtanh.f32 %v1309_v28 }
 0x58b   :  { %1334 = vst [vmem:[#allocation2 + $0x10] sm:$0xff] %v1327_v29  ;;  %v1328_v34 = vmul.f32 0.5, %v1321_v30 }
 0x58c   :  { %1333 = vst [vmem:[#allocation2 + $0x8] sm:$0xff] %v1326_v33 }
 0x58d   :  { %1335 = vst [vmem:[#allocation2 + $0x18] sm:$0xff] %v1328_v34 }
 0x595   :  { %v1721_v35 = vpop.eup %1720 }
 0x596   :  { %v1723_v36 = vpop.eup %1722  ;;  %v1322_v37 = vadd.f32 1.0, %v1721_v35 }
 0x597   :  { %v1725_v38 = vpop.eup %1724  ;;  %v1324_v39 = vadd.f32 1.0, %v1723_v36 }
 0x598   :  { %v1329_v44 = vmul.f32 0.5, %v1322_v37  ;;  %v1323_v40 = vadd.f32 1.0, %v1725_v38 }
 0x599   :  { %v1331_v41 = vmul.f32 0.5, %v1324_v39 }
 0x59a   :  { %1336 = vst [vmem:[#allocation2 + $0x20] sm:$0xff] %v1329_v44  ;;  %v1330_v42 = vmul.f32 0.5, %v1323_v40 }
 0x59b   :  { %1338 = vst.msk [vmem:[#allocation2 + $0x30] sm:$0xff] %vm465_vm1, %v1331_v41 }
 0x59c   :  { %1337 = vst [vmem:[#allocation2 + $0x28] sm:$0xff] %v1330_v42 }
 0x59d   :  { %1757 = shalt.err (!%p1754_p9)
}
 0x59e   :  { %1349 = dma.vmem_to_hbm [thread:$0]  %s1347_s15, 896, %s2213_s14, [#allocation3]  }
 0x59f   :  { %1766 = dma.done.wait [#allocation3], 896  }
 0x5a0   :  { %1767 = vsyncadd [#allocation3], 4294966400 }
 0x5a1   :  { %1768 = dma.done.wait [#allocation5], 128  }
 0x5a2   :  { %1769 = vsyncadd [#allocation5], 4294967168 }
 0x5a3   :  { %1366 = vsyncpa [#allocation3], 1 }
 0x5a4   :  { %1367 = vsyncpa [#allocation5], 1 }

</bundles_post_ra>
